<compile_context>
chip_gen: v6e
topology: v6e:2x2x1
jax: 0.10.0
libtpu: 0.0.40
codegen_flags: <defaults>
</compile_context>

<pallas_src>
import functools

import numpy as np
import jax
import jax.numpy as jnp
from jax import lax
from jax.experimental import pallas as pl
from jax.experimental.pallas import tpu as pltpu


# -----------------------------------------------------------------------------
# Fused kernel. One grid step processes Gb graphs:
#   for each GIN layer l:
#       pooled = adj_g @ h_g          (bf16 x bf16 MXU, f32 accum; self loops in adj)
#       y      = relu((pooled @ W1) * s1 + t1')     (bias folded into t1')
#       h      = relu((y @ W2) * s2 + t2')          (bias folded into t2')
#   h_pooled_g  = sum_n gp_g[n] * h_g[n]            (VPU multiply + XLU reduce)
#   concat_g    = [onehot(candidate_g) @ h_g  |  broadcast(h_pooled_g)]
# -----------------------------------------------------------------------------
def fused_feature_kernel(adj_ref, feat_ref, gp_ref, cand_ref, *rest,
                         num_gin_layers, n_nodes, n_j, gb, input_dim, hidden_dim,
                         use_fma_l0):
    param_refs = rest[:6 * num_gin_layers]
    concat_out_ref, pool_out_ref = rest[6 * num_gin_layers:]

    # Adjacency stays bf16 (exact for 0/1) -- no f32 VMEM copy, native bf16 MXU path.
    adj = adj_ref[...]                                   # (gb, n, n) bf16
    h = feat_ref[...]                                    # (gb, n, F) f32

    # batched matmul: contract adj dim 2 with rhs dim 1; batch over graphs (dim 0)
    dn = (((2,), (1,)), ((0,), (0,)))

    for l in range(num_gin_layers):
        w1, s1, t1, w2, s2, t2 = param_refs[6 * l:6 * l + 6]
        s1v = s1[...].reshape(1, 1, hidden_dim)
        t1v = t1[...].reshape(1, 1, hidden_dim)
        s2v = s2[...].reshape(1, 1, hidden_dim)
        t2v = t2[...].reshape(1, 1, hidden_dim)

        if l == 0 and use_fma_l0:
            # K = input_dim (tiny) matmul done as VPU broadcast-FMAs; then reassociated
            # adj @ (h @ W1) so the lane-sparse (n, F) pooled tensor is never formed.
            w1f = w1[...]                                # (F, H) f32 on the VPU path
            hw = h[:, :, 0:1] * w1f[0:1, :].reshape(1, 1, hidden_dim)
            for f in range(1, input_dim):
                hw = hw + h[:, :, f:f + 1] * w1f[f:f + 1, :].reshape(1, 1, hidden_dim)
            p = lax.dot_general(adj, hw.astype(jnp.bfloat16), dn,
                                preferred_element_type=jnp.float32)
        elif l == 0:
            hw = jnp.dot(h.reshape(gb * n_nodes, input_dim).astype(jnp.bfloat16),
                         w1[...], preferred_element_type=jnp.float32)
            hw = hw.reshape(gb, n_nodes, hidden_dim)
            p = lax.dot_general(adj, hw.astype(jnp.bfloat16), dn,
                                preferred_element_type=jnp.float32)
        else:
            pooled = lax.dot_general(adj, h.astype(jnp.bfloat16), dn,
                                     preferred_element_type=jnp.float32)
            p = jnp.dot(pooled.reshape(gb * n_nodes, hidden_dim).astype(jnp.bfloat16),
                        w1[...], preferred_element_type=jnp.float32)
            p = p.reshape(gb, n_nodes, hidden_dim)

        y = jnp.maximum(p * s1v + t1v, 0.0)              # MLP hidden + BN + ReLU (f32)
        z = jnp.dot(y.reshape(gb * n_nodes, hidden_dim).astype(jnp.bfloat16),
                    w2[...], preferred_element_type=jnp.float32)
        z = z.reshape(gb, n_nodes, hidden_dim)
        h = jnp.maximum(z * s2v + t2v, 0.0)              # per-layer BN + ReLU (f32)

    # Graph pooling: per-graph weights * nodes, cross-sublane sum (no M=1 MXU dot).
    gp = gp_ref[...]                                     # (gb, n, 1) f32
    h_pooled = jnp.sum(gp * h, axis=1)                   # (gb, H) f32
    pool_out_ref[...] = h_pooled.reshape(gb, 1, hidden_dim)

    # Candidate gather as a one-hot matmul (vectorized, no scalar-address path).
    # Out-of-range indices produce all-zero rows (never stale VMEM).
    cand = cand_ref[...]                                 # (gb, n_j, 1) int32
    node_iota = lax.broadcasted_iota(jnp.int32, (gb, n_j, n_nodes), 2)
    onehot = (node_iota == cand).astype(jnp.float32)     # (gb, n_j, n)
    cand_feat = lax.dot_general(onehot, h, (((2,), (1,)), ((0,), (0,))),
                                preferred_element_type=jnp.float32)  # (gb, n_j, H)

    # Emit the concatenated feature directly: lanes [0:H] candidates, [H:2H] pooled.
    pooled_rep = jnp.broadcast_to(h_pooled.reshape(gb, 1, hidden_dim),
                                  (gb, n_j, hidden_dim))
    concat_out_ref[:, :, 0:hidden_dim] = cand_feat
    concat_out_ref[:, :, hidden_dim:2 * hidden_dim] = pooled_rep


# -----------------------------------------------------------------------------
# Pick how many graphs to batch per grid step: biggest divisor of B that fits a
# VMEM budget safe on v5e/v6e/v7x while keeping >= 2 grid steps (v7x dual-TC).
# -----------------------------------------------------------------------------
def _choose_graphs_per_step(B, n_nodes, input_dim, hidden_dim, n_j):
    per_graph = (
        2 * (n_nodes * n_nodes * 2 + n_nodes * input_dim * 4
             + n_nodes * 4 + n_j * 4)                       # double-buffered inputs
        + 2 * (n_j * 2 * hidden_dim * 4 + hidden_dim * 4)   # double-buffered outputs
        + 4 * n_nodes * hidden_dim * 4)                     # live f32 intermediates
    budget = 24 << 20                                       # conservative across chips
    cap = max(1, budget // max(per_graph, 1))
    divisors = [d for d in range(1, B + 1) if B % d == 0 and d <= cap]
    pref = [d for d in divisors if B // d >= 2]             # keep grid >= 2 if possible
    gb = max(pref) if pref else max(divisors)
    return gb, per_graph


# -----------------------------------------------------------------------------
# Wrapper: layout plumbing + single fused pallas_call (grid over graph batches).
# -----------------------------------------------------------------------------
def feature_extractor_forward(adj_blocks, features, candidate, graph_pool, params,
                              *, n_j, n_m, hidden_dim):
    """adj_blocks : (B, n_nodes, n_nodes) per-graph adjacency (incl. self loops)
       features   : (N, F) node features, N = B * n_nodes (disjoint-union layout)
       candidate  : (B, n_j) int32 per-graph node indices in [0, n_nodes)
       graph_pool : (B, N) dense pooling matrix (block structured, as in L2D)
    returns (concat_fea (B, n_j, 2H), h_pooled (B, H))."""
    B, n_nodes, _ = adj_blocks.shape
    F = features.shape[-1]
    num_gin_layers = len(params)
    use_fma_l0 = F <= 8

    feat_b = features.reshape(B, n_nodes, F).astype(jnp.float32)
    # Per-graph pooling weights: only the diagonal (B, n_nodes) block of the (B, N)
    # pooling matrix is used (block structure), laid out as a column (B, n_nodes, 1).
    gp_b = graph_pool.reshape(B, B, n_nodes)[jnp.arange(B), jnp.arange(B), :]
    gp_b = gp_b.reshape(B, n_nodes, 1).astype(jnp.float32)
    # Candidate as a column vector -> vectorized one-hot compare, no in-kernel transpose.
    cand_b = candidate.reshape(B, n_j, 1).astype(jnp.int32)
    # Adjacency streamed as bf16 (0/1 values -> lossless), halves HBM bytes vs f32.
    adj_bf16 = adj_blocks.astype(jnp.bfloat16)

    # Fold MLP biases into eval-mode BatchNorm shifts: bn(x + b) = x*s + (b*s + t).
    # Weights feeding MXU dots are bf16; layer-0 W1 stays f32 for the VPU-FMA path.
    flat_params = []
    for l, (w1, b1, s1, t1, w2, b2, s2, t2) in enumerate(params):
        w1c = w1.astype(jnp.float32) if (l == 0 and use_fma_l0) else w1.astype(jnp.bfloat16)
        flat_params += [w1c, s1.astype(jnp.float32), (t1 + b1 * s1).astype(jnp.float32),
                        w2.astype(jnp.bfloat16), s2.astype(jnp.float32),
                        (t2 + b2 * s2).astype(jnp.float32)]

    Gb, per_graph_bytes = _choose_graphs_per_step(B, n_nodes, F, hidden_dim, n_j)
    grid = (B // Gb,)

    in_specs = [
        pl.BlockSpec((Gb, n_nodes, n_nodes), lambda b: (b, 0, 0)),   # adjacency (bf16)
        pl.BlockSpec((Gb, n_nodes, F), lambda b: (b, 0, 0)),         # node features
        pl.BlockSpec((Gb, n_nodes, 1), lambda b: (b, 0, 0)),         # pooling weights
        pl.BlockSpec((Gb, n_j, 1), lambda b: (b, 0, 0)),             # candidate indices
    ] + [pl.BlockSpec(tuple(p.shape), lambda b: (0, 0)) for p in flat_params]

    out_specs = (
        pl.BlockSpec((Gb, n_j, 2 * hidden_dim), lambda b: (b, 0, 0)),  # concat features
        pl.BlockSpec((Gb, 1, hidden_dim), lambda b: (b, 0, 0)),        # h_pooled
    )

    # VMEM limit: only raise it when the per-step working set needs it; stay below
    # v7x's 64 MiB physical VMEM.
    param_bytes = sum(int(np.prod(p.shape)) * p.dtype.itemsize for p in flat_params)
    per_step_bytes = Gb * per_graph_bytes + 2 * param_bytes
    vmem_limit = None
    if per_step_bytes > (24 << 20):
        vmem_limit = min(int(per_step_bytes * 3 // 2), 56 << 20)

    kernel = functools.partial(
        fused_feature_kernel,
        num_gin_layers=num_gin_layers, n_nodes=n_nodes, n_j=n_j, gb=Gb,
        input_dim=F, hidden_dim=hidden_dim, use_fma_l0=use_fma_l0)

    concat_fea, h_pooled = pl.pallas_call(
        kernel,
        out_shape=(jax.ShapeDtypeStruct((B, n_j, 2 * hidden_dim), jnp.float32),
                   jax.ShapeDtypeStruct((B, 1, hidden_dim), jnp.float32)),
        grid=grid,
        in_specs=in_specs,
        out_specs=out_specs,
        compiler_params=pltpu.CompilerParams(
            dimension_semantics=("parallel",),
            vmem_limit_bytes=vmem_limit),
    )(adj_bf16, feat_b, gp_b, cand_b, *flat_params)

    return concat_fea, h_pooled[:, 0, :]


# -----------------------------------------------------------------------------
# Parameter init (deterministic, synthetic): per GIN layer
#   (w1, b1, s1, t1, w2, b2, s2, t2) with eval-mode BN as per-channel scale/shift.
# -----------------------------------------------------------------------------
def init_params(key, input_dim, hidden_dim, num_gin_layers):
    params = []
    dims_in = [input_dim] + [hidden_dim] * (num_gin_layers - 1)

    def bn_fold(kg, kb, km, kv):
        gamma = 1.0 + 0.1 * jax.random.normal(kg, (1, hidden_dim), jnp.float32)
        beta = 0.1 * jax.random.normal(kb, (1, hidden_dim), jnp.float32)
        mean = 0.1 * jax.random.normal(km, (1, hidden_dim), jnp.float32)
        var = 1.0 + jnp.abs(0.1 * jax.random.normal(kv, (1, hidden_dim), jnp.float32))
        scale = gamma / jnp.sqrt(var + 1e-5)
        shift = beta - mean * scale
        return scale, shift

    for layer in range(num_gin_layers):
        key, *ks = jax.random.split(key, 13)
        din = dims_in[layer]
        w1 = 0.1 * jax.random.normal(ks[0], (din, hidden_dim), jnp.float32)
        b1 = 0.1 * jax.random.normal(ks[1], (1, hidden_dim), jnp.float32)
        w2 = 0.1 * jax.random.normal(ks[2], (hidden_dim, hidden_dim), jnp.float32)
        b2 = 0.1 * jax.random.normal(ks[3], (1, hidden_dim), jnp.float32)
        s1, t1 = bn_fold(ks[4], ks[5], ks[6], ks[7])    # MLP-internal BatchNorm
        s2, t2 = bn_fold(ks[8], ks[9], ks[10], ks[11])  # GraphCNN per-layer BatchNorm
        params.append((w1, b1, s1, t1, w2, b2, s2, t2))
    return params


# -----------------------------------------------------------------------------
# Pure-JAX f32 reference: identical math to the PyTorch module on the dense
# disjoint-union layout.
# -----------------------------------------------------------------------------
def reference_forward(adj_blocks, features, candidate, graph_pool, params,
                      *, n_j, n_m, hidden_dim):
    B = adj_blocks.shape[0]
    adj = jax.scipy.linalg.block_diag(*[adj_blocks[b] for b in range(B)])
    h = features
    for (w1, b1, s1, t1, w2, b2, s2, t2) in params:
        pooled = adj @ h
        y = jnp.maximum((pooled @ w1 + b1) * s1 + t1, 0.0)
        z = y @ w2 + b2
        h = jnp.maximum(z * s2 + t2, 0.0)
    h_pooled = graph_pool @ h
    h_r = h.reshape(B, n_j * n_m, hidden_dim)
    idx = jnp.broadcast_to(candidate[:, :, None], (B, n_j, hidden_dim))
    cand_feat = jnp.take_along_axis(h_r, idx, axis=1)
    hp_rep = jnp.broadcast_to(h_pooled[:, None, :], cand_feat.shape)
    return jnp.concatenate([cand_feat, hp_rep], axis=-1), h_pooled


if __name__ == "__main__":
    # Small shapes consistent with the module's forward.
    B, n_j, n_m = 2, 4, 4
    input_dim, hidden_dim = 2, 32
    num_layers = 3                   # GraphCNN num_layers -> 2 GIN layers
    n_nodes = n_j * n_m
    N = B * n_nodes

    key = jax.random.PRNGKey(0)
    k_feat, k_adj, k_cand, k_param = jax.random.split(key, 4)

    features = jax.random.normal(k_feat, (N, input_dim), jnp.float32)

    # Per-graph symmetric adjacency with self loops (block-diagonal structure of the
    # disjoint-union graph kept factored as (B, n_nodes, n_nodes)).
    a = (jax.random.uniform(k_adj, (B, n_nodes, n_nodes)) < 0.3).astype(jnp.float32)
    a = jnp.maximum(a, jnp.transpose(a, (0, 2, 1)))
    adj_blocks = jnp.maximum(a, jnp.eye(n_nodes, dtype=jnp.float32)[None])

    # Dense average graph-pooling matrix (what the sparse graph_pool encodes in L2D).
    gp = jnp.zeros((B, N), jnp.float32)
    for b in range(B):
        gp = gp.at[b, b * n_nodes:(b + 1) * n_nodes].set(1.0 / n_nodes)

    candidate = jax.random.randint(k_cand, (B, n_j), 0, n_nodes, dtype=jnp.int32)

    params = init_params(k_param, input_dim, hidden_dim, num_layers - 1)

    concat_fea, h_pooled = feature_extractor_forward(
        adj_blocks, features, candidate, gp, params,
        n_j=n_j, n_m=n_m, hidden_dim=hidden_dim)
    jax.block_until_ready((concat_fea, h_pooled))

    assert concat_fea.shape == (B, n_j, 2 * hidden_dim)
    assert h_pooled.shape == (B, hidden_dim)

    ref_concat, ref_pooled = reference_forward(
        adj_blocks, features, candidate, gp, params,
        n_j=n_j, n_m=n_m, hidden_dim=hidden_dim)
    # bf16 weights/activations with f32 accumulation -> slightly looser tolerance
    # than the all-f32 reference.
    np.testing.assert_allclose(np.asarray(concat_fea), np.asarray(ref_concat),
                               rtol=2e-2, atol=2e-2)
    np.testing.assert_allclose(np.asarray(h_pooled), np.asarray(ref_pooled),
                               rtol=2e-2, atol=2e-2)

    print("KERNEL_OK")
</pallas_src>

<mosaic_0001>
module attributes {stable_mosaic.version = 11 : i64} {
  func.func @fused_feature_kernel(%arg0: i32, %arg1: memref<1x16x16xbf16, #tpu.memory_space<vmem>>, %arg2: memref<1x16x2xf32, #tpu.memory_space<vmem>>, %arg3: memref<1x16x1xf32, #tpu.memory_space<vmem>>, %arg4: memref<1x4x1xi32, #tpu.memory_space<vmem>>, %arg5: memref<2x32xf32, #tpu.memory_space<vmem>>, %arg6: memref<1x32xf32, #tpu.memory_space<vmem>>, %arg7: memref<1x32xf32, #tpu.memory_space<vmem>>, %arg8: memref<32x32xbf16, #tpu.memory_space<vmem>>, %arg9: memref<1x32xf32, #tpu.memory_space<vmem>>, %arg10: memref<1x32xf32, #tpu.memory_space<vmem>>, %arg11: memref<32x32xbf16, #tpu.memory_space<vmem>>, %arg12: memref<1x32xf32, #tpu.memory_space<vmem>>, %arg13: memref<1x32xf32, #tpu.memory_space<vmem>>, %arg14: memref<32x32xbf16, #tpu.memory_space<vmem>>, %arg15: memref<1x32xf32, #tpu.memory_space<vmem>>, %arg16: memref<1x32xf32, #tpu.memory_space<vmem>>, %arg17: memref<1x4x64xf32, #tpu.memory_space<vmem>>, %arg18: memref<1x1x32xf32, #tpu.memory_space<vmem>>) attributes {dimension_semantics = [#tpu.dimension_semantics<parallel>], iteration_bounds = array<i64: 2>, scalar_prefetch = 0 : i64, scratch_operands = 0 : i64, tpu.core_type = #tpu.core_type<tc>, window_params = [{transform_indices = @transform_0, window_bounds = array<i64: 1, 16, 16>}, {transform_indices = @transform_1, window_bounds = array<i64: 1, 16, 2>}, {transform_indices = @transform_2, window_bounds = array<i64: 1, 16, 1>}, {transform_indices = @transform_3, window_bounds = array<i64: 1, 4, 1>}, {pipeline_mode = #tpu.pipeline_mode<synchronous>, transform_indices = @transform_4, window_bounds = array<i64: 2, 32>}, {pipeline_mode = #tpu.pipeline_mode<synchronous>, transform_indices = @transform_5, window_bounds = array<i64: 1, 32>}, {pipeline_mode = #tpu.pipeline_mode<synchronous>, transform_indices = @transform_6, window_bounds = array<i64: 1, 32>}, {pipeline_mode = #tpu.pipeline_mode<synchronous>, transform_indices = @transform_7, window_bounds = array<i64: 32, 32>}, {pipeline_mode = #tpu.pipeline_mode<synchronous>, transform_indices = @transform_8, window_bounds = array<i64: 1, 32>}, {pipeline_mode = #tpu.pipeline_mode<synchronous>, transform_indices = @transform_9, window_bounds = array<i64: 1, 32>}, {pipeline_mode = #tpu.pipeline_mode<synchronous>, transform_indices = @transform_10, window_bounds = array<i64: 32, 32>}, {pipeline_mode = #tpu.pipeline_mode<synchronous>, transform_indices = @transform_11, window_bounds = array<i64: 1, 32>}, {pipeline_mode = #tpu.pipeline_mode<synchronous>, transform_indices = @transform_12, window_bounds = array<i64: 1, 32>}, {pipeline_mode = #tpu.pipeline_mode<synchronous>, transform_indices = @transform_13, window_bounds = array<i64: 32, 32>}, {pipeline_mode = #tpu.pipeline_mode<synchronous>, transform_indices = @transform_14, window_bounds = array<i64: 1, 32>}, {pipeline_mode = #tpu.pipeline_mode<synchronous>, transform_indices = @transform_15, window_bounds = array<i64: 1, 32>}, {transform_indices = @transform_16, window_bounds = array<i64: 1, 4, 64>}, {transform_indices = @transform_17, window_bounds = array<i64: 1, 1, 32>}]} {
    %c0 = arith.constant 0 : index
    %c0_0 = arith.constant 0 : index
    %c0_1 = arith.constant 0 : index
    %0 = vector.load %arg1[%c0, %c0_0, %c0_1] : memref<1x16x16xbf16, #tpu.memory_space<vmem>>, vector<1x16x16xbf16>
    %c0_2 = arith.constant 0 : index
    %c0_3 = arith.constant 0 : index
    %c0_4 = arith.constant 0 : index
    %1 = vector.load %arg2[%c0_2, %c0_3, %c0_4] : memref<1x16x2xf32, #tpu.memory_space<vmem>>, vector<1x16x2xf32>
    %c0_5 = arith.constant 0 : index
    %c0_6 = arith.constant 0 : index
    %2 = vector.load %arg6[%c0_5, %c0_6] : memref<1x32xf32, #tpu.memory_space<vmem>>, vector<1x32xf32>
    %3 = vector.shape_cast %2 : vector<1x32xf32> to vector<1x1x32xf32>
    %c0_7 = arith.constant 0 : index
    %c0_8 = arith.constant 0 : index
    %4 = vector.load %arg7[%c0_7, %c0_8] : memref<1x32xf32, #tpu.memory_space<vmem>>, vector<1x32xf32>
    %5 = vector.shape_cast %4 : vector<1x32xf32> to vector<1x1x32xf32>
    %c0_9 = arith.constant 0 : index
    %c0_10 = arith.constant 0 : index
    %6 = vector.load %arg9[%c0_9, %c0_10] : memref<1x32xf32, #tpu.memory_space<vmem>>, vector<1x32xf32>
    %7 = vector.shape_cast %6 : vector<1x32xf32> to vector<1x1x32xf32>
    %c0_11 = arith.constant 0 : index
    %c0_12 = arith.constant 0 : index
    %8 = vector.load %arg10[%c0_11, %c0_12] : memref<1x32xf32, #tpu.memory_space<vmem>>, vector<1x32xf32>
    %9 = vector.shape_cast %8 : vector<1x32xf32> to vector<1x1x32xf32>
    %c0_13 = arith.constant 0 : index
    %c0_14 = arith.constant 0 : index
    %10 = vector.load %arg5[%c0_13, %c0_14] : memref<2x32xf32, #tpu.memory_space<vmem>>, vector<2x32xf32>
    %11 = vector.extract_strided_slice %1 {offsets = [0, 0, 0], sizes = [1, 16, 1], strides = [1, 1, 1]} : vector<1x16x2xf32> to vector<1x16x1xf32>
    %12 = vector.extract_strided_slice %10 {offsets = [0, 0], sizes = [1, 32], strides = [1, 1]} : vector<2x32xf32> to vector<1x32xf32>
    %13 = vector.shape_cast %12 : vector<1x32xf32> to vector<1x1x32xf32>
    %14 = vector.broadcast %11 : vector<1x16x1xf32> to vector<1x16x32xf32>
    %15 = vector.broadcast %13 : vector<1x1x32xf32> to vector<1x16x32xf32>
    %16 = arith.mulf %14, %15 : vector<1x16x32xf32>
    %17 = vector.extract_strided_slice %1 {offsets = [0, 0, 1], sizes = [1, 16, 1], strides = [1, 1, 1]} : vector<1x16x2xf32> to vector<1x16x1xf32>
    %18 = vector.extract_strided_slice %10 {offsets = [1, 0], sizes = [1, 32], strides = [1, 1]} : vector<2x32xf32> to vector<1x32xf32>
    %19 = vector.shape_cast %18 : vector<1x32xf32> to vector<1x1x32xf32>
    %20 = vector.broadcast %17 : vector<1x16x1xf32> to vector<1x16x32xf32>
    %21 = vector.broadcast %19 : vector<1x1x32xf32> to vector<1x16x32xf32>
    %22 = arith.mulf %20, %21 : vector<1x16x32xf32>
    %23 = arith.addf %16, %22 : vector<1x16x32xf32>
    %24 = arith.truncf %23 : vector<1x16x32xf32> to vector<1x16x32xbf16>
    %cst = arith.constant dense<0.000000e+00> : vector<1x16x32xf32>
    %25 = tpu.matmul %0, %24, %cst {dimension_numbers = #tpu.dot_dimension_numbers<[2], [1], [1], [2], [0, 0, 0, 1, 1, 2], [0], [0]>} : vector<1x16x16xbf16>, vector<1x16x32xbf16>, vector<1x16x32xf32> -> vector<1x16x32xf32>
    %26 = vector.broadcast %3 : vector<1x1x32xf32> to vector<1x16x32xf32>
    %27 = arith.mulf %25, %26 : vector<1x16x32xf32>
    %28 = vector.broadcast %5 : vector<1x1x32xf32> to vector<1x16x32xf32>
    %29 = arith.addf %27, %28 : vector<1x16x32xf32>
    %cst_15 = arith.constant 0.000000e+00 : f32
    %30 = vector.broadcast %cst_15 : f32 to vector<1x16x32xf32>
    %31 = arith.maximumf %29, %30 : vector<1x16x32xf32>
    %32 = vector.shape_cast %31 : vector<1x16x32xf32> to vector<16x32xf32>
    %33 = arith.truncf %32 : vector<16x32xf32> to vector<16x32xbf16>
    %c0_16 = arith.constant 0 : index
    %c0_17 = arith.constant 0 : index
    %34 = vector.load %arg8[%c0_16, %c0_17] : memref<32x32xbf16, #tpu.memory_space<vmem>>, vector<32x32xbf16>
    %cst_18 = arith.constant dense<0.000000e+00> : vector<16x32xf32>
    %35 = tpu.matmul %33, %34, %cst_18 {dimension_numbers = #tpu.dot_dimension_numbers<[1], [0], [0], [1], [0, 0, 1, 1], [], []>} : vector<16x32xbf16>, vector<32x32xbf16>, vector<16x32xf32> -> vector<16x32xf32>
    %36 = vector.shape_cast %35 : vector<16x32xf32> to vector<1x16x32xf32>
    %37 = vector.broadcast %7 : vector<1x1x32xf32> to vector<1x16x32xf32>
    %38 = arith.mulf %36, %37 : vector<1x16x32xf32>
    %39 = vector.broadcast %9 : vector<1x1x32xf32> to vector<1x16x32xf32>
    %40 = arith.addf %38, %39 : vector<1x16x32xf32>
    %cst_19 = arith.constant 0.000000e+00 : f32
    %41 = vector.broadcast %cst_19 : f32 to vector<1x16x32xf32>
    %42 = arith.maximumf %40, %41 : vector<1x16x32xf32>
    %c0_20 = arith.constant 0 : index
    %c0_21 = arith.constant 0 : index
    %43 = vector.load %arg12[%c0_20, %c0_21] : memref<1x32xf32, #tpu.memory_space<vmem>>, vector<1x32xf32>
    %44 = vector.shape_cast %43 : vector<1x32xf32> to vector<1x1x32xf32>
    %c0_22 = arith.constant 0 : index
    %c0_23 = arith.constant 0 : index
    %45 = vector.load %arg13[%c0_22, %c0_23] : memref<1x32xf32, #tpu.memory_space<vmem>>, vector<1x32xf32>
    %46 = vector.shape_cast %45 : vector<1x32xf32> to vector<1x1x32xf32>
    %c0_24 = arith.constant 0 : index
    %c0_25 = arith.constant 0 : index
    %47 = vector.load %arg15[%c0_24, %c0_25] : memref<1x32xf32, #tpu.memory_space<vmem>>, vector<1x32xf32>
    %48 = vector.shape_cast %47 : vector<1x32xf32> to vector<1x1x32xf32>
    %c0_26 = arith.constant 0 : index
    %c0_27 = arith.constant 0 : index
    %49 = vector.load %arg16[%c0_26, %c0_27] : memref<1x32xf32, #tpu.memory_space<vmem>>, vector<1x32xf32>
    %50 = vector.shape_cast %49 : vector<1x32xf32> to vector<1x1x32xf32>
    %51 = arith.truncf %42 : vector<1x16x32xf32> to vector<1x16x32xbf16>
    %cst_28 = arith.constant dense<0.000000e+00> : vector<1x16x32xf32>
    %52 = tpu.matmul %0, %51, %cst_28 {dimension_numbers = #tpu.dot_dimension_numbers<[2], [1], [1], [2], [0, 0, 0, 1, 1, 2], [0], [0]>} : vector<1x16x16xbf16>, vector<1x16x32xbf16>, vector<1x16x32xf32> -> vector<1x16x32xf32>
    %53 = vector.shape_cast %52 : vector<1x16x32xf32> to vector<16x32xf32>
    %54 = arith.truncf %53 : vector<16x32xf32> to vector<16x32xbf16>
    %c0_29 = arith.constant 0 : index
    %c0_30 = arith.constant 0 : index
    %55 = vector.load %arg11[%c0_29, %c0_30] : memref<32x32xbf16, #tpu.memory_space<vmem>>, vector<32x32xbf16>
    %cst_31 = arith.constant dense<0.000000e+00> : vector<16x32xf32>
    %56 = tpu.matmul %54, %55, %cst_31 {dimension_numbers = #tpu.dot_dimension_numbers<[1], [0], [0], [1], [0, 0, 1, 1], [], []>} : vector<16x32xbf16>, vector<32x32xbf16>, vector<16x32xf32> -> vector<16x32xf32>
    %57 = vector.shape_cast %56 : vector<16x32xf32> to vector<1x16x32xf32>
    %58 = vector.broadcast %44 : vector<1x1x32xf32> to vector<1x16x32xf32>
    %59 = arith.mulf %57, %58 : vector<1x16x32xf32>
    %60 = vector.broadcast %46 : vector<1x1x32xf32> to vector<1x16x32xf32>
    %61 = arith.addf %59, %60 : vector<1x16x32xf32>
    %cst_32 = arith.constant 0.000000e+00 : f32
    %62 = vector.broadcast %cst_32 : f32 to vector<1x16x32xf32>
    %63 = arith.maximumf %61, %62 : vector<1x16x32xf32>
    %64 = vector.shape_cast %63 : vector<1x16x32xf32> to vector<16x32xf32>
    %65 = arith.truncf %64 : vector<16x32xf32> to vector<16x32xbf16>
    %c0_33 = arith.constant 0 : index
    %c0_34 = arith.constant 0 : index
    %66 = vector.load %arg14[%c0_33, %c0_34] : memref<32x32xbf16, #tpu.memory_space<vmem>>, vector<32x32xbf16>
    %cst_35 = arith.constant dense<0.000000e+00> : vector<16x32xf32>
    %67 = tpu.matmul %65, %66, %cst_35 {dimension_numbers = #tpu.dot_dimension_numbers<[1], [0], [0], [1], [0, 0, 1, 1], [], []>} : vector<16x32xbf16>, vector<32x32xbf16>, vector<16x32xf32> -> vector<16x32xf32>
    %68 = vector.shape_cast %67 : vector<16x32xf32> to vector<1x16x32xf32>
    %69 = vector.broadcast %48 : vector<1x1x32xf32> to vector<1x16x32xf32>
    %70 = arith.mulf %68, %69 : vector<1x16x32xf32>
    %71 = vector.broadcast %50 : vector<1x1x32xf32> to vector<1x16x32xf32>
    %72 = arith.addf %70, %71 : vector<1x16x32xf32>
    %cst_36 = arith.constant 0.000000e+00 : f32
    %73 = vector.broadcast %cst_36 : f32 to vector<1x16x32xf32>
    %74 = arith.maximumf %72, %73 : vector<1x16x32xf32>
    %c0_37 = arith.constant 0 : index
    %c0_38 = arith.constant 0 : index
    %c0_39 = arith.constant 0 : index
    %75 = vector.load %arg3[%c0_37, %c0_38, %c0_39] : memref<1x16x1xf32, #tpu.memory_space<vmem>>, vector<1x16x1xf32>
    %76 = vector.broadcast %75 : vector<1x16x1xf32> to vector<1x16x32xf32>
    %77 = arith.mulf %76, %74 : vector<1x16x32xf32>
    %cst_40 = arith.constant dense<0.000000e+00> : vector<1x32xf32>
    %78 = vector.multi_reduction <add>, %77, %cst_40 [1] : vector<1x16x32xf32> to vector<1x32xf32>
    %79 = vector.shape_cast %78 : vector<1x32xf32> to vector<1x1x32xf32>
    %c0_41 = arith.constant 0 : index
    %c0_42 = arith.constant 0 : index
    %c0_43 = arith.constant 0 : index
    %80 = vector.load %arg18[%c0_41, %c0_42, %c0_43] : memref<1x1x32xf32, #tpu.memory_space<vmem>>, vector<1x1x32xf32>
    tpu.vector_store %arg18[%c0_41, %c0_42, %c0_43], %79 {strides = array<i32>} : memref<1x1x32xf32, #tpu.memory_space<vmem>>, vector<1x1x32xf32>,
    %c0_44 = arith.constant 0 : index
    %c0_45 = arith.constant 0 : index
    %c0_46 = arith.constant 0 : index
    %81 = vector.load %arg4[%c0_44, %c0_45, %c0_46] : memref<1x4x1xi32, #tpu.memory_space<vmem>>, vector<1x4x1xi32>
    %82 = tpu.iota {dimensions = array<i32: 2>} : vector<1x4x16xi32>
    %83 = vector.broadcast %81 : vector<1x4x1xi32> to vector<1x4x16xi32>
    %84 = arith.cmpi eq, %82, %83 : vector<1x4x16xi32>
    %85 = arith.extui %84 : vector<1x4x16xi1> to vector<1x4x16xi32>
    %86 = arith.sitofp %85 : vector<1x4x16xi32> to vector<1x4x16xf32>
    %cst_47 = arith.constant dense<0.000000e+00> : vector<1x4x32xf32>
    %87 = tpu.matmul %86, %74, %cst_47 {dimension_numbers = #tpu.dot_dimension_numbers<[2], [1], [1], [2], [0, 0, 0, 1, 1, 2], [0], [0]>} : vector<1x4x16xf32>, vector<1x16x32xf32>, vector<1x4x32xf32> -> vector<1x4x32xf32>
    %88 = vector.shape_cast %78 : vector<1x32xf32> to vector<1x1x32xf32>
    %89 = vector.shape_cast %88 : vector<1x1x32xf32> to vector<1x1x32xf32>
    %90 = vector.broadcast %89 : vector<1x1x32xf32> to vector<1x4x32xf32>
    %c0_48 = arith.constant 0 : index
    %c0_49 = arith.constant 0 : index
    %c0_50 = arith.constant 0 : index
    %91 = vector.load %arg17[%c0_48, %c0_49, %c0_50] : memref<1x4x64xf32, #tpu.memory_space<vmem>>, vector<1x4x32xf32>
    tpu.vector_store %arg17[%c0_48, %c0_49, %c0_50], %87 {strides = array<i32>} : memref<1x4x64xf32, #tpu.memory_space<vmem>>, vector<1x4x32xf32>,
    %c0_51 = arith.constant 0 : index
    %c0_52 = arith.constant 0 : index
    %c32 = arith.constant 32 : index
    %92 = vector.load %arg17[%c0_51, %c0_52, %c32] : memref<1x4x64xf32, #tpu.memory_space<vmem>>, vector<1x4x32xf32>
    tpu.vector_store %arg17[%c0_51, %c0_52, %c32], %90 {strides = array<i32>} : memref<1x4x64xf32, #tpu.memory_space<vmem>>, vector<1x4x32xf32>,
    return
  }
  func.func @transform_0(%arg0: i32) -> (i32, i32, i32) {
    %c0_i32 = arith.constant 0 : i32
    %c0_i32_0 = arith.constant 0 : i32
    %c0_i32_1 = arith.constant 0 : i32
    return %arg0, %c0_i32, %c0_i32_0 : i32, i32, i32
  }
  func.func @transform_1(%arg0: i32) -> (i32, i32, i32) {
    %c0_i32 = arith.constant 0 : i32
    %c0_i32_0 = arith.constant 0 : i32
    %c0_i32_1 = arith.constant 0 : i32
    return %arg0, %c0_i32, %c0_i32_0 : i32, i32, i32
  }
  func.func @transform_2(%arg0: i32) -> (i32, i32, i32) {
    %c0_i32 = arith.constant 0 : i32
    %c0_i32_0 = arith.constant 0 : i32
    %c0_i32_1 = arith.constant 0 : i32
    return %arg0, %c0_i32, %c0_i32_0 : i32, i32, i32
  }
  func.func @transform_3(%arg0: i32) -> (i32, i32, i32) {
    %c0_i32 = arith.constant 0 : i32
    %c0_i32_0 = arith.constant 0 : i32
    %c0_i32_1 = arith.constant 0 : i32
    return %arg0, %c0_i32, %c0_i32_0 : i32, i32, i32
  }
  func.func @transform_4(%arg0: i32) -> (i32, i32) {
    %c0_i32 = arith.constant 0 : i32
    %c0_i32_0 = arith.constant 0 : i32
    %c0_i32_1 = arith.constant 0 : i32
    return %c0_i32, %c0_i32_0 : i32, i32
  }
  func.func @transform_5(%arg0: i32) -> (i32, i32) {
    %c0_i32 = arith.constant 0 : i32
    %c0_i32_0 = arith.constant 0 : i32
    %c0_i32_1 = arith.constant 0 : i32
    return %c0_i32, %c0_i32_0 : i32, i32
  }
  func.func @transform_6(%arg0: i32) -> (i32, i32) {
    %c0_i32 = arith.constant 0 : i32
    %c0_i32_0 = arith.constant 0 : i32
    %c0_i32_1 = arith.constant 0 : i32
    return %c0_i32, %c0_i32_0 : i32, i32
  }
  func.func @transform_7(%arg0: i32) -> (i32, i32) {
    %c0_i32 = arith.constant 0 : i32
    %c0_i32_0 = arith.constant 0 : i32
    %c0_i32_1 = arith.constant 0 : i32
    return %c0_i32, %c0_i32_0 : i32, i32
  }
  func.func @transform_8(%arg0: i32) -> (i32, i32) {
    %c0_i32 = arith.constant 0 : i32
    %c0_i32_0 = arith.constant 0 : i32
    %c0_i32_1 = arith.constant 0 : i32
    return %c0_i32, %c0_i32_0 : i32, i32
  }
  func.func @transform_9(%arg0: i32) -> (i32, i32) {
    %c0_i32 = arith.constant 0 : i32
    %c0_i32_0 = arith.constant 0 : i32
    %c0_i32_1 = arith.constant 0 : i32
    return %c0_i32, %c0_i32_0 : i32, i32
  }
  func.func @transform_10(%arg0: i32) -> (i32, i32) {
    %c0_i32 = arith.constant 0 : i32
    %c0_i32_0 = arith.constant 0 : i32
    %c0_i32_1 = arith.constant 0 : i32
    return %c0_i32, %c0_i32_0 : i32, i32
  }
  func.func @transform_11(%arg0: i32) -> (i32, i32) {
    %c0_i32 = arith.constant 0 : i32
    %c0_i32_0 = arith.constant 0 : i32
    %c0_i32_1 = arith.constant 0 : i32
    return %c0_i32, %c0_i32_0 : i32, i32
  }
  func.func @transform_12(%arg0: i32) -> (i32, i32) {
    %c0_i32 = arith.constant 0 : i32
    %c0_i32_0 = arith.constant 0 : i32
    %c0_i32_1 = arith.constant 0 : i32
    return %c0_i32, %c0_i32_0 : i32, i32
  }
  func.func @transform_13(%arg0: i32) -> (i32, i32) {
    %c0_i32 = arith.constant 0 : i32
    %c0_i32_0 = arith.constant 0 : i32
    %c0_i32_1 = arith.constant 0 : i32
    return %c0_i32, %c0_i32_0 : i32, i32
  }
  func.func @transform_14(%arg0: i32) -> (i32, i32) {
    %c0_i32 = arith.constant 0 : i32
    %c0_i32_0 = arith.constant 0 : i32
    %c0_i32_1 = arith.constant 0 : i32
    return %c0_i32, %c0_i32_0 : i32, i32
  }
  func.func @transform_15(%arg0: i32) -> (i32, i32) {
    %c0_i32 = arith.constant 0 : i32
    %c0_i32_0 = arith.constant 0 : i32
    %c0_i32_1 = arith.constant 0 : i32
    return %c0_i32, %c0_i32_0 : i32, i32
  }
  func.func @transform_16(%arg0: i32) -> (i32, i32, i32) {
    %c0_i32 = arith.constant 0 : i32
    %c0_i32_0 = arith.constant 0 : i32
    %c0_i32_1 = arith.constant 0 : i32
    return %arg0, %c0_i32, %c0_i32_0 : i32, i32, i32
  }
  func.func @transform_17(%arg0: i32) -> (i32, i32, i32) {
    %c0_i32 = arith.constant 0 : i32
    %c0_i32_0 = arith.constant 0 : i32
    %c0_i32_1 = arith.constant 0 : i32
    return %arg0, %c0_i32, %c0_i32_0 : i32, i32, i32
  }
}

</mosaic_0001>

<bundles_post_ra>
// kernel: tpu_custom_call.1
= control target key start
LH: loop header
LB: loop body
LE: loop exit
PB: predicated region body
PF: predicated region fallthrough
CT: control target
= control target key end

     0   :  { %s1839_s0 = inlined_call_operand.vmem [shape: bf16[2,16,16], index: 0, kind: input, shape index: {}]   ;;  %s1840_s1 = inlined_call_operand.vmem [shape: f32[2,16,2], index: 1, kind: input, shape index: {}]   ;;  %s1841_s2 = inlined_call_operand.vmem [shape: f32[2,16,1], index: 2, kind: input, shape index: {}]   ;;  %s1842_s3 = inlined_call_operand.vmem [shape: s32[2,4,1], index: 3, kind: input, shape index: {}]   ;;  %s1843_s4 = inlined_call_operand.vmem [shape: f32[2,32], index: 4, kind: input, shape index: {}]   ;;  %s1844_s5 = inlined_call_operand.vmem [shape: f32[1,32], index: 5, kind: input, shape index: {}]   ;;  %s1845_s6 = inlined_call_operand.vmem [shape: f32[1,32], index: 6, kind: input, shape index: {}]   ;;  %s1846_s7 = inlined_call_operand.vmem [shape: bf16[32,32], index: 7, kind: input, shape index: {}]   ;;  %s1847_s8 = inlined_call_operand.vmem [shape: f32[1,32], index: 8, kind: input, shape index: {}]   ;;  %s1848_s9 = inlined_call_operand.vmem [shape: f32[1,32], index: 9, kind: input, shape index: {}]   ;;  %s1849_s10 = inlined_call_operand.vmem [shape: bf16[32,32], index: 10, kind: input, shape index: {}]   ;;  %s1850_s11 = inlined_call_operand.vmem [shape: f32[1,32], index: 11, kind: input, shape index: {}]   ;;  %s1851_s12 = inlined_call_operand.vmem [shape: f32[1,32], index: 12, kind: input, shape index: {}]   ;;  %s1852_s13 = inlined_call_operand.vmem [shape: bf16[32,32], index: 13, kind: input, shape index: {}]   ;;  %s1853_s14 = inlined_call_operand.vmem [shape: f32[1,32], index: 14, kind: input, shape index: {}]   ;;  %s1854_s15 = inlined_call_operand.vmem [shape: f32[1,32], index: 15, kind: input, shape index: {}]   ;;  %s1855_s16 = inlined_call_operand.hbm [shape: f32[2,4,64], index: 16, kind: output, shape index: {0}]   ;;  %s1856_s17 = inlined_call_operand.hbm [shape: f32[2,1,32], index: 17, kind: output, shape index: {1}]  }
   0x1   :  { %1864 = sst [smem:[#allocation14_spill]] %s1839_s0 }
   0x2   :  { %1865 = sst [smem:[#allocation15_spill]] %s1840_s1 }
   0x3   :  { %1866 = sst [smem:[#allocation16_spill]] %s1841_s2 }
   0x4   :  { %1867 = sst [smem:[#allocation17_spill]] %s1855_s16 }
   0x5   :  { %23 = vsyncpa [#allocation3], 0 }
   0x6   :  { %25 = vsyncpa [#allocation3 + $0x1], 0 }
   0x7   :  { %26 = vsyncpa [#allocation5], 0 }
   0x8   :  { %28 = vsyncpa [#allocation5 + $0x1], 0  ;;  %s1627_s24 = smov 0   ;;  %s1629_s25 = smov 0  }
   0x9   :  { %s1631_s26 = smov 0   ;;  %s1633_s27 = smov 0  }
   0xa LB: > { %1868 = sst [smem:[#allocation8_spill]] %s1516_s24  ;;  %s1648_s28 = sadd.s32 4294967295, %s1528_s27   ;;  %s1528_s27 = sphi %s1633_s27, %s1883_s27   ;;  %s1524_s26 = sphi %s1631_s26, %s1885_s26   ;;  %s1520_s25 = sphi %s1629_s25, %s1887_s25   ;;  %s1516_s24 = sphi %s1627_s24, %s1886_s24  }
   0xb   : > { %1869 = sst [smem:[#allocation9_spill]] %s1524_s26  ;;  %s1278_s29 = sadd.s32 4294967294, %s1528_s27  }
   0xc   : > { %1870 = sst [smem:[#allocation10_spill]] %s1528_s27  ;;  %s1652_s0 = sadd.s32 1, %s1528_s27  }
   0xd   : > { %1871 = sst [smem:[#allocation11_spill]] %s1652_s0  ;;  %s397_s30 = sadd.s32 1, %s1524_s26 }
   0xe   : > { %s394_s18 = ssub.s32 %s1528_s27, %s1652_s0  ;;  %p407_p0 = scmp.ne.s32.totalorder %s1524_s26, %s1520_s25 }
   0xf   : > { %p395_p1 = scmp.eq.s32.totalorder %s394_s18, 0  ;;  %p408_p2 = scmp.eq.s32.totalorder %s1648_s28, 1 }
  0x10   : > { %p413_p3 = scmp.ne.s32.totalorder %s1520_s25, %s1516_s24  ;;  %p414_p4 = scmp.eq.s32.totalorder %s1278_s29, 1 }
  0x11   : > { %s1663_s19 = scalar_select %p395_p1, %s1524_s26, %s397_s30  }
  0x12   : > { %p1665_p5 = por %p408_p2, %p407_p0  ;;  %p1669_p6 = por %p414_p4, %p413_p3 }
  0x13   : > { %1872 = sst [smem:[#allocation12_spill]] %s1663_s19  ;;  %p1281_p7 = scmp.ge.s32.totalorder %s1528_s27, 1 }
  0x14   : > { %s1874_s20 = scalar_select %p1669_p6, 1, 0 }
  0x15   : > { %p525_p8 = scmp.lt.s32.totalorder %s1528_s27, 3 }
  0x16   : > { %1875 = sst [smem:[#allocation13_spill]] %s1874_s20 }
  0x17   : > { %p526_p9 = pnand %p1281_p7, %p525_p8 }
  0x18   : > { %p595_p10 = scmp.lt.s32.totalorder (!%p526_p9), %s1648_s28, 1  ;;  %s1876_s30 = sld [smem:[#allocation15_spill]] (!%p526_p9) }
  0x19   : > { %529 = sbr.rel (%p526_p9) target bundleno = 1402 (0x57a), region = 84  ;;  %s1877_s2 = sld [smem:[#allocation16_spill]] (!%p526_p9) }
  0x1a   : > { %s1878_s16 = sld [smem:[#allocation14_spill]] (!%p526_p9)  ;;  %s1314_s23 = sshll.u32 (!%p526_p9), %s1648_s28, 4 }
  0x1b   : > { %s1153_s0 = scalar_lea.hbm (!%p526_p9), %s1856_s17, %s1314_s23 }
  0x1e   : > { %v1530_v0 = vmov 1   ;;  %v1531_v1 = vmov 0   ;;  %s596_s21 = scalar_select %p595_p10, %s1648_s28, 1  ;;  %v1532_v4 = vmov 0.0   ;;  %vm1533_vm0 = vmmov 0   ;;  %v1432_v26 = vld [vmem:[%s1846_s7 + $0x8] sm:$0xff]  }
  0x1f   : > { %1429 = vset.pattern.permute.xlu1 %v1530_v0  ;;  %1428 = vset.pattern.permute.xlu0 %v1531_v1  ;;  %v634_v7 = vlaneseq  ;;  %v623_v11 = vld [vmem:[%s1843_s4] sm:$0x3]  ;;  %vm662_vm1 = vcmask 130048   ;;  %vm742_vm2 = vcmask 261120   ;;  %v1434_v54 = vld [vmem:[%s1849_s10 + $0x8] sm:$0xff]   ;;  %vm1032_vm4 = vcmask 253952  }
  0x20   : > { %s1318_s22 = sshll.u32 %s596_s21, 4  ;;  %s1289_s19 = sshll.u32 %s596_s21, 2  ;;  %1336 = vmatprep.subr.bf16.mxu0 %v1532_v4  ;;  %1342 = vmatprep.subr.bf16.mxu1 %v1532_v4  ;;  %v1433_v27 = vld [vmem:[%s1846_s7] sm:$0xff]   ;;  %v1436_v61 = vld [vmem:[%s1852_s13 + $0x8] sm:$0xff]  }
  0x21   : > { %s604_s18 = scalar_lea.vmem %s1876_s30, %s1318_s22  ;;  %s613_s20 = scalar_lea.vmem %s1842_s3, %s1289_s19  ;;  %1338 = vmatprep.mubr.msk.bf16.mxu0 %vm1533_vm0, %v1532_v4  ;;  %1346 = vmatprep.mubr.msk.bf16.mxu1 %vm1533_vm0, %v1532_v4  ;;  %v635_v8 = vshrl.u32 %v634_v7, 7  ;;  %v1292_v28 = vld [vmem:[%s1844_s5] ss:$0 sm:$0xff] }
  0x22   : > { %v617_v2 = vld [vmem:[%s604_s18] sm:$0xff]  ;;  %v618_v3 = vld [vmem:[%s604_s18 + $0x8] sm:$0xff]  ;;  %s1317_s24 = sshll.u32 %s596_s21, 3  ;;  %s1688_s30 = scalar_lea.vmem %s1877_s2, %s1318_s22  ;;  %1343 = vmatpush3.bf16.msra.mxu1 %v1432_v26 }
  0x23   : > { %641 = vperm.xlu1 %1429, %v617_v2   ;;  %626 = vperm.xlu0 %1428, %v617_v2   ;;  %v1034_v5 = vld [vmem:[%s613_s20] sm:$0xf]  ;;  %s599_s26 = scalar_lea.vmem %s1878_s16, %s1317_s24  ;;  %v1010_v6 = vld [vmem:[%s1688_s30 + $0x8] sm:$0xff]  ;;  %v650_v9 = vsub.s32 1, %v635_v8  ;;  %v636_v10 = vsub.s32 0, %v635_v8  ;;  %s1772_s20 = sand.u32 1, %s1520_s25  }
  0x24   : > { %v1431_v25 = vld [vmem:[%s599_s26] sm:$0xff]   ;;  %1344 = vmatprep.subr.bf16.mxu1 %v1532_v4  ;;  %s1534_s21 = smov 32   ;;  %s594_s22 = scalar_lea.vmem [#allocation4], %s1772_s20 }
  0x25   : > { %v651_v12 = vrot.slane %v623_v11, %v650_v9  ;;  %v637_v13 = vrot.slane %v623_v11, %v636_v10  ;;  %v1293_v31 = vld [vmem:[%s1845_s6] ss:$0 sm:$0xff]  ;;  %s1155_s29 = sshll.u32 %s594_s22, 4  ;;  %s1130_s27 = scalar_lea.sflag [#allocation5], %s1772_s20  ;;  %s1156_s29 = int_to_ptr.vmem [resolvable:$true] %s1155_s29 }
  0x26   : > { %1345 = vmatpush3.bf16.msra.mxu1 %v1433_v27  ;;  %v1297_v41 = vld [vmem:[%s1847_s8] ss:$0 sm:$0xff]  ;;  %s1535_s16 = smov [#allocation4]  }
  0x27   : > { %645 = vperm.xlu1 %1429, %v618_v3   ;;  %631 = vperm.xlu0 %1428, %v618_v3   ;;  %v1298_v44 = vld [vmem:[%s1848_s9] ss:$0 sm:$0xff]  ;;  %s1442_s24 = sshll.u32 %s1535_s16, 4  ;;  %s1443_s24 = int_to_ptr.vmem [resolvable:$false] %s1442_s24 }
  0x28   : > { %1356 = vmatprep.subr.bf16.mxu1 %v1532_v4  ;;  %v1435_v55 = vld [vmem:[%s1849_s10] sm:$0xff]   ;;  %s1444_s19 = scalar_lea.vmem %s1443_s24, 32  ;;  %p1445_p0 = scmp.lt.s32.totalorder %s1156_s29, %s1443_s24 }
  0x29   : > { %v1437_v62 = vld [vmem:[%s1852_s13] sm:$0xff]  }
  0x2a   : > { %v1009_v63 = vld [vmem:[%s1688_s30] sm:$0xff]  ;;  %s1438_s30 = scalar_lea.vmem %s1156_s29, 16 }
  0x2b   : > { %1038 = vperm.xlu0 %1428, %v1034_v5   ;;  %1430 = vset.pattern.permute.xlu1 %v1531_v1  ;;  %v1303_v0 = vld [vmem:[%s1850_s11] ss:$0 sm:$0xff]  ;;  %p1439_p11 = scmp.ne.s32.totalorder %s1156_s29, %s1438_s30  ;;  %p1446_p1 = scmp.lt.s32.totalorder %s1444_s19, %s1438_s30 }
  0x2c   : > { %1013 = vperm.xlu1 %1430, %v1009_v63   ;;  %v1304_v3 = vld [vmem:[%s1851_s12] ss:$0 sm:$0xff] }
  0x2d   : > { %p1440_p12 = pnand %p1439_p11, %p1665_p5  ;;  %p1447_p2 = por %p1446_p1, %p1445_p0 }
  0x2f   : > { %1018 = vperm.xlu0 %1428, %v1010_v6   ;;  %p1441_p13 = pneg %p1440_p12 }
  0x31   : > { %p1448_p3 = pnand %p1447_p2, %p1441_p13 }
  0x9e   : > { %v642_v14 = vpop.permute.xlu1 %641  ;;  %v627_v15 = vpop.permute.xlu0 %626 }
  0x9f   : > { %v652_v16 = vmul.f32 %v651_v12, %v642_v14  ;;  %v638_v17 = vmul.f32 %v637_v13, %v627_v15  ;;  %v1308_v15 = vld [vmem:[%s1853_s14] ss:$0 sm:$0xff] }
  0xa1   : > { %v654_v22 = vadd.f32 %v652_v16, %v638_v17  ;;  %v1309_v16 = vld [vmem:[%s1854_s15] ss:$0 sm:$0xff] }
  0xa2   : > { %v646_v18 = vpop.permute.xlu1 %645  ;;  %v632_v19 = vpop.permute.xlu0 %631 }
  0xa3   : > { %v653_v20 = vmul.f32 %v651_v12, %v646_v18  ;;  %v639_v21 = vmul.f32 %v637_v13, %v632_v19 }
  0xa5   : > { %v655_v23 = vadd.f32 %v653_v20, %v639_v21 }
  0xa6   : > { %v1039_v21 = vpop.permute.xlu0 %1038 }
  0xa7   : > { %v656_v24 = vpack.c.bf16 %v655_v23, %v654_v22  ;;  %v1014_v26 = vpop.permute.xlu1 %1013 }
  0xa9   : > { %1337 = vmatpush3.bf16.msra.mxu0 %v656_v24 }
  0xaa   : > { %1350 = vmatprep.subr.bf16.mxu0 %v1532_v4 }
  0xac   : > { %1339 = vmatmul.mubr.msk.bf16.vlgmr.msra.gmra.mxu0 %vm662_vm1, %v1431_v25 }
  0xad   : > { %1352 = vmatprep.mubr.msk.bf16.mxu0 %vm1533_vm0, %v1532_v4 }
 0x16c   : > { %v700_v29 = vpop.f32.mrf.mxu0 }
 0x16d   : > { %v713_v30 = vmul.f32 %v1292_v28, %v700_v29 }
 0x16e   : > { %v1340_v32 = vpop.f32.mrf.mxu0 }
 0x16f   : > { %v721_v34 = vadd.f32 %v1293_v31, %v713_v30 }
 0x170   : > { %v703_v33 = vpop.f32.mrf.mxu0 }
 0x171   : > { %v714_v35 = vmul.f32 %v1292_v28, %v703_v33  ;;  %v723_v38 = vmax.f32 %v721_v34, 0.0 }
 0x172   : > { %v1341_v36 = vpop.f32.mrf.mxu0 }
 0x173   : > { %v722_v37 = vadd.f32 %v1293_v31, %v714_v35  ;;  %v1019_v31 = vpop.permute.xlu0 %1018 }
 0x175   : > { %v724_v39 = vmax.f32 %v722_v37, 0.0 }
 0x177   : > { %v725_v40 = vpack.c.bf16 %v724_v39, %v723_v38 }
 0x179   : > { %1347 = vmatmul.mubr.msk.bf16.vlgmr.msra.gmra.mxu1 %vm742_vm2, %v725_v40 }
 0x17a   : > { %1360 = vmatprep.mubr.msk.bf16.mxu1 %vm1533_vm0, %v1532_v4  ;;  %1357 = vmatpush3.bf16.msra.mxu1 %v1434_v54 }
 0x17b   : > { %1358 = vmatprep.subr.bf16.mxu1 %v1532_v4 }
 0x17e   : > { %1359 = vmatpush3.bf16.msra.mxu1 %v1435_v55 }
 0x17f   : > { %1372 = vmatprep.subr.mxu1 %v1532_v4 }
 0x239   : > { %v780_v42 = vpop.f32.mrf.mxu1 }
 0x23a   : > { %v793_v43 = vmul.f32 %v1297_v41, %v780_v42 }
 0x23b   : > { %v1348_v45 = vpop.f32.mrf.mxu1 }
 0x23c   : > { %v801_v47 = vadd.f32 %v1298_v44, %v793_v43 }
 0x23d   : > { %v783_v46 = vpop.f32.mrf.mxu1 }
 0x23e   : > { %v794_v48 = vmul.f32 %v1297_v41, %v783_v46  ;;  %v803_v51 = vmax.f32 %v801_v47, 0.0 }
 0x23f   : > { %v1349_v49 = vpop.f32.mrf.mxu1 }
 0x240   : > { %v802_v50 = vadd.f32 %v1298_v44, %v794_v48 }
 0x242   : > { %v804_v52 = vmax.f32 %v802_v50, 0.0 }
 0x244   : > { %v809_v53 = vpack.c.bf16 %v804_v52, %v803_v51 }
 0x246   : > { %1351 = vmatpush3.bf16.msra.mxu0 %v809_v53 }
 0x247   : > { %1364 = vmatprep.subr.bf16.mxu0 %v1532_v4 }
 0x249   : > { %1353 = vmatmul.mubr.msk.bf16.vlgmr.msra.gmra.mxu0 %vm662_vm1, %v1431_v25  ;;  %v1036_v25 = vand.u32 127, %v634_v7 }
 0x24a   : > { %1368 = vmatprep.mubr.msk.bf16.mxu0 %vm1533_vm0, %v1532_v4  ;;  %1365 = vmatpush3.bf16.msra.mxu0 %v1436_v61 }
 0x24b   : > { %1366 = vmatprep.subr.bf16.mxu0 %v1532_v4  ;;  %vm1040_vm3 = vcmp.eq.s32.totalorder %v1036_v25, %v1039_v21 }
 0x24c   : > { %v1310_v33 = vsel %vm1040_vm3, 1.0, %v1532_v4 }
 0x24e   : > { %1367 = vmatpush3.bf16.msra.mxu0 %v1437_v62 }
 0x309   : > { %v844_v56 = vpop.f32.mrf.mxu0 }
 0x30b   : > { %v1354_v57 = vpop.f32.mrf.mxu0 }
 0x30d   : > { %v847_v58 = vpop.f32.mrf.mxu0 }
 0x30e   : > { %v851_v59 = vpack.c.bf16 %v847_v58, %v844_v56 }
 0x30f   : > { %v1355_v60 = vpop.f32.mrf.mxu0 }
 0x310   : > { %1361 = vmatmul.mubr.msk.bf16.vlgmr.msra.gmra.mxu1 %vm742_vm2, %v851_v59 }
 0x311   : > { %1376 = vmatprep.mubr.msk.f32.mxu1 %vm1533_vm0, %v1532_v4 }
 0x3d0   : > { %v905_v1 = vpop.f32.mrf.mxu1 }
 0x3d1   : > { %v918_v2 = vmul.f32 %v1303_v0, %v905_v1 }
 0x3d2   : > { %v1362_v5 = vpop.f32.mrf.mxu1 }
 0x3d3   : > { %v926_v8 = vadd.f32 %v1304_v3, %v918_v2 }
 0x3d4   : > { %v908_v6 = vpop.f32.mrf.mxu1 }
 0x3d5   : > { %v919_v9 = vmul.f32 %v1303_v0, %v908_v6  ;;  %v928_v12 = vmax.f32 %v926_v8, 0.0 }
 0x3d6   : > { %v1363_v10 = vpop.f32.mrf.mxu1 }
 0x3d7   : > { %v927_v11 = vadd.f32 %v1304_v3, %v919_v9 }
 0x3d9   : > { %v929_v13 = vmax.f32 %v927_v11, 0.0 }
 0x3db   : > { %v930_v14 = vpack.c.bf16 %v929_v13, %v928_v12 }
 0x3dd   : > { %1369 = vmatmul.mubr.msk.bf16.vlgmr.msra.gmra.mxu0 %vm742_vm2, %v930_v14 }
 0x49d   : > { %v984_v17 = vpop.f32.mrf.mxu0 }
 0x49e   : > { %v997_v18 = vmul.f32 %v1308_v15, %v984_v17 }
 0x49f   : > { %v1370_v19 = vpop.f32.mrf.mxu0 }
 0x4a0   : > { %v1005_v20 = vadd.f32 %v1309_v16, %v997_v18 }
 0x4a1   : > { %v987_v22 = vpop.f32.mrf.mxu0 }
 0x4a2   : > { %v998_v23 = vmul.f32 %v1308_v15, %v987_v22  ;;  %v1007_v24 = vmax.f32 %v1005_v20, 0.0 }
 0x4a3   : > { %v1371_v27 = vpop.f32.mrf.mxu0 }
 0x4a4   : > { %v1006_v28 = vadd.f32 %v1309_v16, %v998_v23  ;;  %v1021_v30 = vmul.f32 %v1014_v26, %v1007_v24 }
 0x4a6   : > { %v1008_v29 = vmax.f32 %v1006_v28, 0.0  ;;  %v1023_v34 = vsel %vm742_vm2, %v1021_v30, 0.0 }
 0x4a8   : > { %v1022_v32 = vmul.f32 %v1019_v31, %v1008_v29  ;;  %1373 = vmatpush3.msra.mxu1 %v1008_v29 }
 0x4a9   : > { %1374 = vmatprep.subr.mxu1 %v1532_v4 }
 0x4aa   : > { %v1024_v35 = vsel %vm742_vm2, %v1022_v32, 0.0  ;;  %1375 = vmatpush3.msra.mxu1 %v1007_v24 }
 0x4ab   : > { %v1025_v7 = vadd.f32 %v1024_v35, %v1023_v34  ;;  %1377 = vmatmul.mubr.msk.f32.vlgmr.msra.gmra.mxu1 %vm662_vm1, %v1310_v33 }
 0x4ad   : > { %v1026_v36 = vrot.slane %v1025_v7, 4 }
 0x4af   : > { %v1027_v37 = vadd.f32 %v1026_v36, %v1025_v7 }
 0x4b1   : > { %v1028_v38 = vrot.slane %v1027_v37, 2 }
 0x4b3   : > { %v1029_v39 = vadd.f32 %v1028_v38, %v1027_v37 }
 0x4b5   : > { %v1030_v40 = vrot.slane %v1029_v39, 1 }
 0x4b7   : > { %v1031_v4 = vadd.f32 %v1030_v40, %v1029_v39 }
 0x4b9   : > { %1119 = vrot.lane.b32.xlu1 %v1031_v4, %s1534_s21  ;;  %1033 = vst.msk [vmem:[%s594_s22] sm:$0x1] %vm1032_vm4, %v1031_v4 }
 0x4ba   : > { %1451 = shalt.err (!%p1448_p3)
}
 0x4bb   : > { %s1452_s21 = scalar_lea.hbm %s1153_s0, 16  ;;  %s1456_s18 = scalar_lea.hbm %s1856_s17, 32 }
 0x4bc   : > { %p1453_p4 = scmp.ne.s32.totalorder %s1153_s0, %s1452_s21  ;;  %p1457_p9 = scmp.lt.s32.totalorder %s1153_s0, %s1856_s17 }
 0x4bd   : > { %p1458_p10 = scmp.lt.s32.totalorder %s1456_s18, %s1452_s21 }
 0x4be   : > { %p1454_p7 = pnand %p1453_p4, %p1665_p5 }
 0x4bf   : > { %p1459_p11 = por %p1458_p10, %p1457_p9 }
 0x4c0   : > { %p1455_p8 = pneg %p1454_p7 }
 0x4c2   : > { %p1460_p12 = pnand %p1459_p11, %p1455_p8 }
 0x4c4   : > { %1463 = shalt.err (!%p1460_p12)
}
 0x4c5   : > { %1380 = dma.vmem_to_hbm [thread:$0]  (%p1665_p5), %s1156_s29, 16, %s1153_s0, %s1130_s27   ;;  %vm1116_vm5 = vcmask 257024   ;;  %vm1122_vm6 = vcmask 519424  }
 0x4c6   : > { %s1282_s30 = sshll.u32 %s1772_s20, 2  ;;  %s1313_s16 = sshll.u32 %s1648_s28, 6 }
 0x4c7   : > { %s588_s24 = scalar_lea.vmem [#allocation2], %s1282_s30  ;;  %s1879_s21 = sld [smem:[#allocation17_spill]] }
 0x4c8   : > { %s1142_s19 = sshll.u32 %s588_s24, 4  ;;  %s1125_s28 = scalar_lea.sflag [#allocation3], %s1772_s20  ;;  %s1799_s19 = int_to_ptr.vmem [resolvable:$true] %s1142_s19 }
 0x4c9   : > { %s1464_s29 = scalar_lea.vmem %s1799_s19, 64  ;;  %s1536_s0 = smov [#allocation2]  }
 0x4ca   : > { %p1465_p13 = scmp.ne.s32.totalorder %s1799_s19, %s1464_s29  ;;  %s1468_s27 = sshll.u32 %s1536_s0, 4  ;;  %s1469_s27 = int_to_ptr.vmem [resolvable:$false] %s1468_s27 }
 0x4cb   : > { %s1470_s18 = scalar_lea.vmem %s1469_s27, 128  ;;  %p1471_p2 = scmp.lt.s32.totalorder %s1799_s19, %s1469_s27 }
 0x4cc   : > { %p1466_p0 = pnand %p1465_p13, %p1665_p5  ;;  %p1472_p3 = scmp.lt.s32.totalorder %s1470_s18, %s1464_s29 }
 0x4cd   : > { %s1797_s23 = scalar_lea.hbm %s1879_s21, %s1313_s16 }
 0x4ce   : > { %p1467_p1 = pneg %p1466_p0  ;;  %p1473_p4 = por %p1472_p3, %p1471_p2 }
 0x4d0   : > { %p1474_p7 = pnand %p1473_p4, %p1467_p1 }
 0x52b   : > { %v1120_v42 = vpop.permute.xlu1 %1119 }
 0x56b   : > { %v1112_v41 = vpop.f32.mrf.mxu1 }
 0x56c   : > { %1117 = vst.msk [vmem:[%s588_s24] sm:$0xf] %vm1116_vm5, %v1112_v41 }
 0x56d   : > { %v1378_v43 = vpop.f32.mrf.mxu1  ;;  %1123 = vst.msk [vmem:[%s588_s24] sm:$0xf] %vm1122_vm6, %v1120_v42 }
 0x56e   : > { %1477 = shalt.err (!%p1474_p7)
}
 0x56f   : > { %s1478_s26 = scalar_lea.hbm %s1797_s23, 64  ;;  %s1482_s16 = scalar_lea.hbm %s1879_s21, 128 }
 0x570   : > { %p1479_p8 = scmp.ne.s32.totalorder %s1797_s23, %s1478_s26  ;;  %p1483_p11 = scmp.lt.s32.totalorder %s1797_s23, %s1879_s21 }
 0x571   : > { %p1484_p12 = scmp.lt.s32.totalorder %s1482_s16, %s1478_s26 }
 0x572   : > { %p1480_p9 = pnand %p1479_p8, %p1665_p5 }
 0x573   : > { %p1485_p13 = por %p1484_p12, %p1483_p11 }
 0x574   : > { %p1481_p10 = pneg %p1480_p9 }
 0x576   : > { %p1486_p0 = pnand %p1485_p13, %p1481_p10 }
 0x578   : > { %1489 = shalt.err (!%p1486_p0)
}
 0x579   : > { %1379 = dma.vmem_to_hbm [thread:$0]  (%p1665_p5), %s1799_s19, 64, %s1797_s23, %s1125_s28  }
 0x57a PF: > { %s1880_s22 = sld [smem:[#allocation10_spill]] }
 0x57b   : > { %s1881_s29 = sld [smem:[#allocation8_spill]] }
 0x580   : > { %p1390_p1 = scmp.ge.s32.totalorder %s1880_s22, 2 }
 0x581   : > { %s1167_s27 = sand.u32 1, %s1881_s29  }
 0x582   : > { %p1384_p2 = pnand %p1390_p1, %p1669_p6  ;;  %s1168_s18 = scalar_lea.sflag [#allocation3], %s1167_s27 }
 0x584   : > { %p1385_p3 = pneg %p1384_p2 }
 0x586   : > { %1507 = dma.done.wait (%p1385_p3), %s1168_s18, 64  }
 0x587   : > { %1509 = vsyncadd (%p1385_p3), %s1168_s18, 4294967232  ;;  %s1177_s26 = scalar_lea.sflag [#allocation5], %s1167_s27 }
 0x588   : > { %1511 = dma.done.wait (%p1385_p3), %s1177_s26, 16  }
 0x589   : > { %1513 = vsyncadd (%p1385_p3), %s1177_s26, 4294967280  ;;  %s1883_s27 = sld [smem:[#allocation11_spill]]  ;;  %s1886_s24 = smov %s1520_s25 }
 0x58a   : > { %s1884_s1 = sld [smem:[#allocation9_spill]] }
 0x58b   : > { %s1885_s26 = sld [smem:[#allocation12_spill]] }
 0x58f   : > { %p31_p5 = scmp.ge.s32.totalorder %s1883_s27, 4  }
 0x590   : > { %s1887_s25 = smov %s1884_s1 }
 0x591   :  { %33 = sbr.rel (!%p31_p5) target bundleno = 10 (0xa), region = 145 }
 0x596   :  { %1181 = vsyncpa [#allocation3], 1 }
 0x597   :  { %1183 = vsyncpa [#allocation3 + $0x1], 1 }
 0x598   :  { %1184 = vsyncpa [#allocation5], 1 }
 0x599   :  { %1186 = vsyncpa [#allocation5 + $0x1], 1 }

</bundles_post_ra>
